<compile_context>
chip_gen: v5e
topology: v5e:2x2
jax: 0.10.0
libtpu: 0.0.40
codegen_flags: <defaults>
</compile_context>

<pallas_src>
import functools

import jax
import jax.numpy as jnp
from jax.experimental import pallas as pl
from jax.experimental.pallas import tpu as pltpu


def _round_up(x: int, m: int) -> int:
    return ((x + m - 1) // m) * m


def matmul_bias_kernel(x_ref, w_ref, b_ref, o_ref):
    """out(i,j) += x(i,k) @ w(k,j), with bias(j) folded into the k==0 init.

    The output block index is k-invariant, so o_ref is resident in VMEM across
    the whole reduction and acts directly as the f32 accumulator.
    """
    k = pl.program_id(2)

    @pl.when(k == 0)
    def _init():
        # Bias folded into the accumulator init: no finalize add needed.
        o_ref[...] = jnp.broadcast_to(b_ref[...], o_ref.shape)

    # Hot loop: pure MXU matmul-accumulate in f32.
    o_ref[...] += jnp.dot(
        x_ref[...], w_ref[...], preferred_element_type=jnp.float32
    )


def _tiles_for_device():
    """Per-generation tile table (tm, tn, tk)."""
    try:
        kind = jax.devices()[0].device_kind.lower()
    except Exception:
        kind = ""
    if "v6" in kind:
        # 128 MiB VMEM, ~1.4 TB/s HBM: larger tiles to cross into compute-bound.
        # Double-buffered working set ~= 2*(2+4+2) MiB = 16 MiB < 32 MiB default.
        return 512, 1024, 1024
    if "v7" in kind:
        # 64 MiB VMEM per TC: keep working set modest (~10 MiB); lane-dense N tile.
        return 512, 1024, 512
    # v5e / unknown: 512-class tiles already saturate compute; safe everywhere.
    return 512, 512, 512


@functools.partial(jax.jit, static_argnames=("tm", "tn", "tk"))
def _pallas_linear_impl(x, weight, bias, *, tm, tn, tk):
    M, K = x.shape
    _, N = weight.shape

    # Clamp tiles to the (8,128)-aligned problem size (tiny inputs -> one block;
    # also keeps small-M workloads from collapsing the parallel grid needlessly).
    tm = min(tm, _round_up(M, 8))
    tn = min(tn, _round_up(N, 128))
    tk = min(tk, _round_up(K, 128))

    Mp = _round_up(M, tm)
    Np = _round_up(N, tn)
    Kp = _round_up(K, tk)

    # Only materialize padded copies when actually required (padding the two big
    # operands costs a full extra HBM read+write on a memory-bound kernel).
    x_p = x if (Mp == M and Kp == K) else jnp.pad(x, ((0, Mp - M), (0, Kp - K)))
    w_p = (
        weight
        if (Kp == K and Np == N)
        else jnp.pad(weight, ((0, Kp - K), (0, Np - N)))
    )
    b_p = (bias if Np == N else jnp.pad(bias, ((0, Np - N),))).reshape(1, Np)

    grid = (Mp // tm, Np // tn, Kp // tk)

    cost = pl.CostEstimate(
        flops=2 * M * N * K,
        transcendentals=0,
        bytes_accessed=(M * K + K * N + N + M * N) * 4,
    )

    out_p = pl.pallas_call(
        matmul_bias_kernel,
        out_shape=jax.ShapeDtypeStruct((Mp, Np), jnp.float32),
        grid_spec=pltpu.PrefetchScalarGridSpec(
            num_scalar_prefetch=0,
            grid=grid,
            in_specs=[
                pl.BlockSpec((tm, tk), lambda i, j, k: (i, k)),
                pl.BlockSpec((tk, tn), lambda i, j, k: (k, j)),
                pl.BlockSpec((1, tn), lambda i, j, k: (0, j)),
            ],
            out_specs=pl.BlockSpec((tm, tn), lambda i, j, k: (i, j)),
        ),
        compiler_params=pltpu.CompilerParams(
            dimension_semantics=("parallel", "parallel", "arbitrary"),
        ),
        cost_estimate=cost,
    )(x_p, w_p, b_p)

    if Mp == M and Np == N:
        return out_p
    return out_p[:M, :N]


# Below ~4 MFLOPs the pad + launch + slice dominates; use XLA's fused dot+bias.
_SMALL_FLOPS_THRESHOLD = 1 << 22


def pallas_linear(x, weight, bias, *, force_pallas=False):
    M, K = x.shape
    Kw, N = weight.shape
    assert K == Kw, (K, Kw)
    assert bias.shape == (N,), bias.shape

    x = x.astype(jnp.float32)
    weight = weight.astype(jnp.float32)
    bias = bias.astype(jnp.float32)

    if not force_pallas and 2 * M * N * K < _SMALL_FLOPS_THRESHOLD:
        return x @ weight + bias

    tm, tn, tk = _tiles_for_device()
    return _pallas_linear_impl(x, weight, bias, tm=tm, tn=tn, tk=tk)


if __name__ == "__main__":
    key = jax.random.PRNGKey(0)
    kx, kw, kb = jax.random.split(key, 3)

    # Module implies x: (2, 2); nn.Linear(2, 2) -> weight (2, 2), bias (2,)
    x = jax.random.normal(kx, (2, 2), dtype=jnp.float32)
    weight = jax.random.normal(kw, (2, 2), dtype=jnp.float32) * 0.5
    bias = jax.random.normal(kb, (2,), dtype=jnp.float32) * 0.1

    ref = x @ weight + bias

    # 1) Exercise the actual Pallas kernel at the module's 2x2 shape.
    out_pallas = pallas_linear(x, weight, bias, force_pallas=True)
    jax.block_until_ready(out_pallas)
    assert out_pallas.shape == ref.shape, (out_pallas.shape, ref.shape)
    assert jnp.allclose(out_pallas, ref, atol=1e-5), (out_pallas, ref)

    # 2) Default path (small-shape fallback) must also match.
    out_fast = pallas_linear(x, weight, bias)
    jax.block_until_ready(out_fast)
    assert jnp.allclose(out_fast, ref, atol=1e-5)

    # 3) Sanity-check the multi-tile, non-aligned path as well.
    kx2, kw2, kb2 = jax.random.split(jax.random.PRNGKey(1), 3)
    M2, K2, N2 = 300, 700, 520  # deliberately non-aligned
    x2 = jax.random.normal(kx2, (M2, K2), dtype=jnp.float32)
    w2 = jax.random.normal(kw2, (K2, N2), dtype=jnp.float32) * 0.05
    b2 = jax.random.normal(kb2, (N2,), dtype=jnp.float32) * 0.1
    out2 = pallas_linear(x2, w2, b2)
    jax.block_until_ready(out2)
    ref2 = x2 @ w2 + b2
    assert jnp.allclose(out2, ref2, atol=2e-3, rtol=2e-3)

    print("KERNEL_OK")
</pallas_src>

<mosaic_0001>
module attributes {stable_mosaic.version = 11 : i64} {
  func.func @matmul_bias_kernel(%arg0: i32, %arg1: i32, %arg2: i32, %arg3: memref<8x128xf32, #tpu.memory_space<vmem>>, %arg4: memref<128x128xf32, #tpu.memory_space<vmem>>, %arg5: memref<1x128xf32, #tpu.memory_space<vmem>>, %arg6: memref<8x128xf32, #tpu.memory_space<vmem>>) attributes {dimension_semantics = [#tpu.dimension_semantics<parallel>, #tpu.dimension_semantics<parallel>, #tpu.dimension_semantics<arbitrary>], iteration_bounds = array<i64: 1, 1, 1>, scalar_prefetch = 0 : i64, scratch_operands = 0 : i64, tpu.core_type = #tpu.core_type<tc>, window_params = [{transform_indices = @transform_0, window_bounds = array<i64: 8, 128>}, {transform_indices = @transform_1, window_bounds = array<i64: 128, 128>}, {transform_indices = @transform_2, window_bounds = array<i64: 1, 128>}, {transform_indices = @transform_3, window_bounds = array<i64: 8, 128>}]} {
    %c0_i32 = arith.constant 0 : i32
    %0 = arith.cmpi eq, %arg2, %c0_i32 : i32
    %1 = arith.extui %0 : i1 to i32
    %c0_i32_0 = arith.constant 0 : i32
    %2 = arith.cmpi ne, %1, %c0_i32_0 : i32
    scf.if %2 {
      %c0_8 = arith.constant 0 : index
      %c0_9 = arith.constant 0 : index
      %9 = vector.load %arg5[%c0_8, %c0_9] : memref<1x128xf32, #tpu.memory_space<vmem>>, vector<1x128xf32>
      %10 = vector.shape_cast %9 : vector<1x128xf32> to vector<1x128xf32>
      %11 = vector.broadcast %10 : vector<1x128xf32> to vector<8x128xf32>
      %c0_10 = arith.constant 0 : index
      %c0_11 = arith.constant 0 : index
      %12 = vector.load %arg6[%c0_10, %c0_11] : memref<8x128xf32, #tpu.memory_space<vmem>>, vector<8x128xf32>
      tpu.vector_store %arg6[%c0_10, %c0_11], %11 {strides = array<i32>} : memref<8x128xf32, #tpu.memory_space<vmem>>, vector<8x128xf32>,
    } else {
    }
    %c0 = arith.constant 0 : index
    %c0_1 = arith.constant 0 : index
    %3 = vector.load %arg6[%c0, %c0_1] : memref<8x128xf32, #tpu.memory_space<vmem>>, vector<8x128xf32>
    %c0_2 = arith.constant 0 : index
    %c0_3 = arith.constant 0 : index
    %4 = vector.load %arg3[%c0_2, %c0_3] : memref<8x128xf32, #tpu.memory_space<vmem>>, vector<8x128xf32>
    %c0_4 = arith.constant 0 : index
    %c0_5 = arith.constant 0 : index
    %5 = vector.load %arg4[%c0_4, %c0_5] : memref<128x128xf32, #tpu.memory_space<vmem>>, vector<128x128xf32>
    %cst = arith.constant dense<0.000000e+00> : vector<8x128xf32>
    %6 = tpu.matmul %4, %5, %cst {dimension_numbers = #tpu.dot_dimension_numbers<[1], [0], [0], [1], [0, 0, 1, 1], [], []>} : vector<8x128xf32>, vector<128x128xf32>, vector<8x128xf32> -> vector<8x128xf32>
    %7 = arith.addf %3, %6 : vector<8x128xf32>
    %c0_6 = arith.constant 0 : index
    %c0_7 = arith.constant 0 : index
    %8 = vector.load %arg6[%c0_6, %c0_7] : memref<8x128xf32, #tpu.memory_space<vmem>>, vector<8x128xf32>
    tpu.vector_store %arg6[%c0_6, %c0_7], %7 {strides = array<i32>} : memref<8x128xf32, #tpu.memory_space<vmem>>, vector<8x128xf32>,
    return
  }
  func.func @transform_0(%arg0: i32, %arg1: i32, %arg2: i32) -> (i32, i32) {
    %c0_i32 = arith.constant 0 : i32
    return %arg0, %arg2 : i32, i32
  }
  func.func @transform_1(%arg0: i32, %arg1: i32, %arg2: i32) -> (i32, i32) {
    %c0_i32 = arith.constant 0 : i32
    return %arg2, %arg1 : i32, i32
  }
  func.func @transform_2(%arg0: i32, %arg1: i32, %arg2: i32) -> (i32, i32) {
    %c0_i32 = arith.constant 0 : i32
    %c0_i32_0 = arith.constant 0 : i32
    return %c0_i32, %arg1 : i32, i32
  }
  func.func @transform_3(%arg0: i32, %arg1: i32, %arg2: i32) -> (i32, i32) {
    %c0_i32 = arith.constant 0 : i32
    return %arg0, %arg1 : i32, i32
  }
}

</mosaic_0001>

<bundles_post_ra>
// kernel: _pallas_linear_impl.1
= control target key start
LH: loop header
LB: loop body
LE: loop exit
PB: predicated region body
PF: predicated region fallthrough
CT: control target
= control target key end

     0   :  { %s145_s1 = inlined_call_operand.vmem [shape: f32[128,128], index: 1, kind: input, shape index: {}]   ;;  %s146_s2 = inlined_call_operand.vmem [shape: f32[1,128], index: 2, kind: input, shape index: {}]   ;;  %s147_s0 = inlined_call_operand.vmem [shape: f32[8,128], index: 0, kind: input, shape index: {}]   ;;  %s148_s3 = inlined_call_operand.vmem [shape: f32[8,128], index: 3, kind: output, shape index: {}]  }
   0x1   :  { %v40_v0 = vld [vmem:[%s145_s1 + $0x78] sm:$0xff]  ;;  %v39_v1 = vld [vmem:[%s145_s1 + $0x70] sm:$0xff]  ;;  %v38_v2 = vld [vmem:[%s145_s1 + $0x68] sm:$0xff] }
   0x2   :  { %41 = vmatpush.msra.mxu0 %v40_v0  ;;  %v37_v3 = vld [vmem:[%s145_s1 + $0x60] sm:$0xff]  ;;  %v36_v4 = vld [vmem:[%s145_s1 + $0x58] sm:$0xff]  ;;  %v35_v5 = vld [vmem:[%s145_s1 + $0x50] sm:$0xff] }
   0x3   :  { %v34_v6 = vld [vmem:[%s145_s1 + $0x48] sm:$0xff]  ;;  %v33_v7 = vld [vmem:[%s145_s1 + $0x40] sm:$0xff]  ;;  %v32_v8 = vld [vmem:[%s145_s1 + $0x38] sm:$0xff] }
   0x4   :  { %42 = vmatpush.msra.mxu0 %v39_v1  ;;  %v31_v9 = vld [vmem:[%s145_s1 + $0x30] sm:$0xff]  ;;  %v30_v10 = vld [vmem:[%s145_s1 + $0x28] sm:$0xff]  ;;  %v29_v11 = vld [vmem:[%s145_s1 + $0x20] sm:$0xff] }
   0x5   :  { %v28_v12 = vld [vmem:[%s145_s1 + $0x18] sm:$0xff]  ;;  %v27_v13 = vld [vmem:[%s145_s1 + $0x10] sm:$0xff]  ;;  %v26_v14 = vld [vmem:[%s145_s1 + $0x8] sm:$0xff] }
   0x6   :  { %43 = vmatpush.msra.mxu0 %v38_v2  ;;  %v25_v15 = vld [vmem:[%s145_s1] sm:$0xff] }
   0x7   :  { %v24_v16 = vld [vmem:[%s147_s0] sm:$0xff] }
   0x8   :  { %44 = vmatpush.msra.mxu0 %v37_v3  ;;  %v67_v17 = vld [vmem:[%s146_s2] ss:$0 sm:$0xff] }
   0xa   :  { %45 = vmatpush.msra.mxu0 %v36_v4 }
   0xc   :  { %46 = vmatpush.msra.mxu0 %v35_v5 }
   0xe   :  { %47 = vmatpush.msra.mxu0 %v34_v6 }
  0x10   :  { %48 = vmatpush.msra.mxu0 %v33_v7 }
  0x12   :  { %49 = vmatpush.msra.mxu0 %v32_v8 }
  0x14   :  { %50 = vmatpush.msra.mxu0 %v31_v9 }
  0x16   :  { %51 = vmatpush.msra.mxu0 %v30_v10 }
  0x18   :  { %52 = vmatpush.msra.mxu0 %v29_v11 }
  0x1a   :  { %53 = vmatpush.msra.mxu0 %v28_v12 }
  0x1c   :  { %54 = vmatpush.msra.mxu0 %v27_v13 }
  0x1e   :  { %55 = vmatpush.msra.mxu0 %v26_v14 }
  0x20   :  { %56 = vmatpush.msra.mxu0 %v25_v15 }
  0x21   :  { %57 = vmatmul.f32.vlgmr.msra.gmra.mxu0 %v24_v16 }
  0x9e   :  { %v58_v18 = vpop.f32.mrf.mxu0 }
  0x9f   :  { %v61_v19 = vadd.f32 %v67_v17, %v58_v18 }
  0xa1   :  { %62 = vst [vmem:[%s148_s3] sm:$0xff] %v61_v19 }

</bundles_post_ra>
